<compile_context>
chip_gen: v5e
topology: v5e:2x2
jax: 0.10.0
libtpu: 0.0.40
codegen_flags: <defaults>
</compile_context>

<pallas_src>
import functools

import jax
import jax.numpy as jnp
from jax.experimental import pallas as pl
from jax.experimental.pallas import tpu as pltpu

_NEG_BIG = -1e30  # finite stand-in for -inf (avoids inf-arithmetic corner cases)


def _round_up(n, m):
    return ((n + m - 1) // m) * m


def _nmr_re_kernel(x_ref, w1_ref, b1_ref, w2_ref, b2_ref, w3_ref, b3_ref,
                   out_ref, m1_ref, z1_ref, m2_ref, z2_ref, *, true_rows):
    p = pl.program_id(0)          # pass: 0 = stats(h1), 1 = stats(h2), 2 = emit
    i = pl.program_id(1)          # batch tile index
    tile = x_ref.shape[0]

    # Validity mask for zero-padded batch rows (true_rows is a static Python int).
    row = jax.lax.broadcasted_iota(jnp.int32, (tile, 1), 0) + i * tile
    valid = row < true_rows

    # Layer-1 pre-activation.  The x tile is streamed (bf16) and h1 is recomputed
    # each pass; for Din=32 re-streaming x is cheaper than round-tripping h1.
    h1 = (jnp.dot(x_ref[...], w1_ref[...], preferred_element_type=jnp.float32)
          + b1_ref[...])

    # ---- pass 0: column-wise (dim=0) running max / sum-exp of h1 --------------
    @pl.when(p == 0)
    def _():
        @pl.when(i == 0)
        def _():
            m1_ref[...] = jnp.full(m1_ref.shape, _NEG_BIG, m1_ref.dtype)
            z1_ref[...] = jnp.zeros_like(z1_ref)
        t_max = jnp.max(jnp.where(valid, h1, _NEG_BIG), axis=0, keepdims=True)
        m_new = jnp.maximum(m1_ref[...], t_max)
        t_sum = jnp.sum(jnp.where(valid, jnp.exp(h1 - m_new), 0.0),
                        axis=0, keepdims=True)
        z1_ref[...] = z1_ref[...] * jnp.exp(m1_ref[...] - m_new) + t_sum
        m1_ref[...] = m_new

    # ---- pass 1: normalized s1 via folded shift, running stats of h2 ----------
    @pl.when(p == 1)
    def _():
        @pl.when(i == 0)
        def _():
            # Fold the denominator: softmax = exp(h1 - (max + log(sumexp))).
            m1_ref[...] = m1_ref[...] + jnp.log(z1_ref[...])
            m2_ref[...] = jnp.full(m2_ref.shape, _NEG_BIG, m2_ref.dtype)
            z2_ref[...] = jnp.zeros_like(z2_ref)
        s1 = jnp.exp(h1 - m1_ref[...])                      # softmax(h1, dim=0)
        h2 = (jnp.dot(s1.astype(jnp.bfloat16), w2_ref[...],
                      preferred_element_type=jnp.float32) + b2_ref[...])
        t_max = jnp.max(jnp.where(valid, h2, _NEG_BIG), axis=0, keepdims=True)
        m_new = jnp.maximum(m2_ref[...], t_max)
        t_sum = jnp.sum(jnp.where(valid, jnp.exp(h2 - m_new), 0.0),
                        axis=0, keepdims=True)
        z2_ref[...] = z2_ref[...] * jnp.exp(m2_ref[...] - m_new) + t_sum
        m2_ref[...] = m_new

    # ---- pass 2: emit output tiles --------------------------------------------
    @pl.when(p == 2)
    def _():
        @pl.when(i == 0)
        def _():
            m2_ref[...] = m2_ref[...] + jnp.log(z2_ref[...])
        s1 = jnp.exp(h1 - m1_ref[...])
        h2 = (jnp.dot(s1.astype(jnp.bfloat16), w2_ref[...],
                      preferred_element_type=jnp.float32) + b2_ref[...])
        s2 = jnp.exp(h2 - m2_ref[...])                      # softmax(h2, dim=0)
        out_ref[...] = (jnp.dot(s2.astype(jnp.bfloat16), w3_ref[...],
                                preferred_element_type=jnp.float32)
                        + b3_ref[...]).astype(out_ref.dtype)


def nmr_re_forward(x, params, *, block_rows=1024):
    """x: (B, input_dim) float -> (B, output_dim) float32."""
    B, Din = x.shape
    h1_real = params["w1"].shape[1]     # 120
    h2_real = params["w2"].shape[1]     # 8
    d_out = params["w3"].shape[1]

    # Lane-dense padded feature dims (zero weights in the padding).
    H1 = _round_up(h1_real, 128)
    H2 = _round_up(h2_real, 128)
    DO = _round_up(d_out, 128)

    # Batch tile: multiple of 16 (bf16 sublane packing), clamped to the batch.
    tile = _round_up(min(block_rows, _round_up(B, 16)), 16)
    b_pad = _round_up(B, tile)
    n_tiles = b_pad // tile

    f32, bf16 = jnp.float32, jnp.bfloat16
    xp = jnp.zeros((b_pad, Din), bf16).at[:B].set(x.astype(bf16))
    w1 = jnp.zeros((Din, H1), bf16).at[:, :h1_real].set(params["w1"].astype(bf16))
    b1 = jnp.zeros((1, H1), f32).at[:, :h1_real].set(params["b1"].reshape(1, -1))
    w2 = jnp.zeros((H1, H2), bf16).at[:h1_real, :h2_real].set(params["w2"].astype(bf16))
    b2 = jnp.zeros((1, H2), f32).at[:, :h2_real].set(params["b2"].reshape(1, -1))
    w3 = jnp.zeros((H2, DO), bf16).at[:h2_real, :d_out].set(params["w3"].astype(bf16))
    b3 = jnp.zeros((1, DO), f32).at[:, :d_out].set(params["b3"].reshape(1, -1))

    kernel = functools.partial(_nmr_re_kernel, true_rows=B)

    out = pl.pallas_call(
        kernel,
        out_shape=jax.ShapeDtypeStruct((b_pad, DO), f32),
        grid_spec=pltpu.PrefetchScalarGridSpec(
            num_scalar_prefetch=0,
            grid=(3, n_tiles),                               # (pass, batch tile)
            in_specs=[
                pl.BlockSpec((tile, Din), lambda p, i: (i, 0)),   # x: streamed
                pl.BlockSpec((Din, H1), lambda p, i: (0, 0)),     # weights/biases:
                pl.BlockSpec((1, H1), lambda p, i: (0, 0)),       #   fetched once,
                pl.BlockSpec((H1, H2), lambda p, i: (0, 0)),      #   VMEM-resident
                pl.BlockSpec((1, H2), lambda p, i: (0, 0)),
                pl.BlockSpec((H2, DO), lambda p, i: (0, 0)),
                pl.BlockSpec((1, DO), lambda p, i: (0, 0)),
            ],
            out_specs=pl.BlockSpec((tile, DO), lambda p, i: (i, 0)),
            scratch_shapes=[
                pltpu.VMEM((1, H1), f32),   # m1 (later c1 = m1 + log z1)
                pltpu.VMEM((1, H1), f32),   # z1
                pltpu.VMEM((1, H2), f32),   # m2 (later c2)
                pltpu.VMEM((1, H2), f32),   # z2
            ],
        ),
        compiler_params=pltpu.CompilerParams(
            dimension_semantics=("arbitrary", "arbitrary"),
            vmem_limit_bytes=32 * 1024 * 1024,
        ),
    )(xp, w1, b1, w2, b2, w3, b3)

    return out[:B, :d_out]


def init_params(key, input_dim, output_dim, hidden_size=8, mid=120):
    """Deterministic synthetic parameters (PyTorch-Linear-like uniform init)."""
    ks = jax.random.split(key, 6)

    def linear(kw, kb, fan_in, fan_out):
        bound = 1.0 / jnp.sqrt(jnp.float32(fan_in))
        w = jax.random.uniform(kw, (fan_in, fan_out), jnp.float32, -bound, bound)
        b = jax.random.uniform(kb, (1, fan_out), jnp.float32, -bound, bound)
        return w, b

    w1, b1 = linear(ks[0], ks[1], input_dim, mid)           # begin
    w2, b2 = linear(ks[2], ks[3], mid, hidden_size)         # hidden[0]
    w3, b3 = linear(ks[4], ks[5], hidden_size, output_dim)  # end
    return {"w1": w1, "b1": b1, "w2": w2, "b2": b2, "w3": w3, "b3": b3}


def _reference_forward(x, p):
    """Pure-JAX f32 reference for sanity checking."""
    h1 = x @ p["w1"] + p["b1"]
    s1 = jax.nn.softmax(h1, axis=0)
    h2 = s1 @ p["w2"] + p["b2"]
    s2 = jax.nn.softmax(h2, axis=0)
    return s2 @ p["w3"] + p["b3"]


if __name__ == "__main__":
    key = jax.random.PRNGKey(0)
    k_x, k_p, k_x2 = jax.random.split(key, 3)

    batch, input_dim, output_dim = 8, 32, 16
    x = jax.random.normal(k_x, (batch, input_dim), dtype=jnp.float32)
    params = init_params(k_p, input_dim, output_dim)

    out = jax.block_until_ready(nmr_re_forward(x, params))
    ref = _reference_forward(x, params)
    assert out.shape == (batch, output_dim)
    # bf16 MXU operands -> looser tolerance than the f32 reference.
    assert jnp.allclose(out, ref, atol=1e-2, rtol=1e-2), \
        float(jnp.max(jnp.abs(out - ref)))

    # Multi-tile batch: softmax(dim=0) must couple rows across batch tiles.
    x2 = jax.random.normal(k_x2, (40, input_dim), dtype=jnp.float32)
    out2 = jax.block_until_ready(nmr_re_forward(x2, params, block_rows=16))
    ref2 = _reference_forward(x2, params)
    assert out2.shape == (40, output_dim)
    assert jnp.allclose(out2, ref2, atol=1e-2, rtol=1e-2), \
        float(jnp.max(jnp.abs(out2 - ref2)))

    print("KERNEL_OK")
</pallas_src>

<mosaic_0001>
module attributes {stable_mosaic.version = 11 : i64} {
  func.func @_nmr_re_kernel(%arg0: i32, %arg1: i32, %arg2: memref<16x32xbf16, #tpu.memory_space<vmem>>, %arg3: memref<32x128xbf16, #tpu.memory_space<vmem>>, %arg4: memref<1x128xf32, #tpu.memory_space<vmem>>, %arg5: memref<128x128xbf16, #tpu.memory_space<vmem>>, %arg6: memref<1x128xf32, #tpu.memory_space<vmem>>, %arg7: memref<128x128xbf16, #tpu.memory_space<vmem>>, %arg8: memref<1x128xf32, #tpu.memory_space<vmem>>, %arg9: memref<16x128xf32, #tpu.memory_space<vmem>>, %arg10: memref<1x128xf32, #tpu.memory_space<vmem>>, %arg11: memref<1x128xf32, #tpu.memory_space<vmem>>, %arg12: memref<1x128xf32, #tpu.memory_space<vmem>>, %arg13: memref<1x128xf32, #tpu.memory_space<vmem>>) attributes {dimension_semantics = [#tpu.dimension_semantics<arbitrary>, #tpu.dimension_semantics<arbitrary>], iteration_bounds = array<i64: 3, 1>, scalar_prefetch = 0 : i64, scratch_operands = 4 : i64, tpu.core_type = #tpu.core_type<tc>, window_params = [{transform_indices = @transform_0, window_bounds = array<i64: 16, 32>}, {pipeline_mode = #tpu.pipeline_mode<synchronous>, transform_indices = @transform_1, window_bounds = array<i64: 32, 128>}, {pipeline_mode = #tpu.pipeline_mode<synchronous>, transform_indices = @transform_2, window_bounds = array<i64: 1, 128>}, {pipeline_mode = #tpu.pipeline_mode<synchronous>, transform_indices = @transform_3, window_bounds = array<i64: 128, 128>}, {pipeline_mode = #tpu.pipeline_mode<synchronous>, transform_indices = @transform_4, window_bounds = array<i64: 1, 128>}, {pipeline_mode = #tpu.pipeline_mode<synchronous>, transform_indices = @transform_5, window_bounds = array<i64: 128, 128>}, {pipeline_mode = #tpu.pipeline_mode<synchronous>, transform_indices = @transform_6, window_bounds = array<i64: 1, 128>}, {transform_indices = @transform_7, window_bounds = array<i64: 16, 128>}]} {
    %0 = tpu.iota {dimensions = array<i32: 0>} : vector<16x1xi32>
    %c16_i32 = arith.constant 16 : i32
    %1 = arith.muli %arg1, %c16_i32 : i32
    %2 = vector.broadcast %1 : i32 to vector<16x1xi32>
    %3 = arith.addi %0, %2 : vector<16x1xi32>
    %c8_i32 = arith.constant 8 : i32
    %4 = vector.broadcast %c8_i32 : i32 to vector<16x1xi32>
    %5 = arith.cmpi slt, %3, %4 : vector<16x1xi32>
    %c0 = arith.constant 0 : index
    %c0_0 = arith.constant 0 : index
    %6 = vector.load %arg2[%c0, %c0_0] : memref<16x32xbf16, #tpu.memory_space<vmem>>, vector<16x32xbf16>
    %c0_1 = arith.constant 0 : index
    %c0_2 = arith.constant 0 : index
    %7 = vector.load %arg3[%c0_1, %c0_2] : memref<32x128xbf16, #tpu.memory_space<vmem>>, vector<32x128xbf16>
    %cst = arith.constant dense<0.000000e+00> : vector<16x128xf32>
    %8 = tpu.matmul %6, %7, %cst {dimension_numbers = #tpu.dot_dimension_numbers<[1], [0], [0], [1], [0, 0, 1, 1], [], []>} : vector<16x32xbf16>, vector<32x128xbf16>, vector<16x128xf32> -> vector<16x128xf32>
    %c0_3 = arith.constant 0 : index
    %c0_4 = arith.constant 0 : index
    %9 = vector.load %arg4[%c0_3, %c0_4] : memref<1x128xf32, #tpu.memory_space<vmem>>, vector<1x128xf32>
    %10 = vector.broadcast %9 : vector<1x128xf32> to vector<16x128xf32>
    %11 = arith.addf %8, %10 : vector<16x128xf32>
    %c0_i32 = arith.constant 0 : i32
    %12 = arith.cmpi eq, %arg0, %c0_i32 : i32
    %13 = arith.extui %12 : i1 to i32
    %c0_i32_5 = arith.constant 0 : i32
    %14 = arith.cmpi ne, %13, %c0_i32_5 : i32
    scf.if %14 {
      %c0_i32_8 = arith.constant 0 : i32
      %21 = arith.cmpi eq, %arg1, %c0_i32_8 : i32
      %22 = arith.extui %21 : i1 to i32
      %c0_i32_9 = arith.constant 0 : i32
      %23 = arith.cmpi ne, %22, %c0_i32_9 : i32
      scf.if %23 {
        %cst_24 = arith.constant -1.000000e+30 : f32
        %49 = vector.broadcast %cst_24 : f32 to vector<1x128xf32>
        %c0_25 = arith.constant 0 : index
        %c0_26 = arith.constant 0 : index
        %50 = vector.load %arg10[%c0_25, %c0_26] : memref<1x128xf32, #tpu.memory_space<vmem>>, vector<1x128xf32>
        tpu.vector_store %arg10[%c0_25, %c0_26], %49 {strides = array<i32>} : memref<1x128xf32, #tpu.memory_space<vmem>>, vector<1x128xf32>,
        %cst_27 = arith.constant 0.000000e+00 : f32
        %51 = vector.broadcast %cst_27 : f32 to vector<1x128xf32>
        %c0_28 = arith.constant 0 : index
        %c0_29 = arith.constant 0 : index
        %52 = vector.load %arg11[%c0_28, %c0_29] : memref<1x128xf32, #tpu.memory_space<vmem>>, vector<1x128xf32>
        tpu.vector_store %arg11[%c0_28, %c0_29], %51 {strides = array<i32>} : memref<1x128xf32, #tpu.memory_space<vmem>>, vector<1x128xf32>,
      } else {
      }
      %cst_10 = arith.constant -1.000000e+30 : f32
      %24 = vector.shape_cast %5 : vector<16x1xi1> to vector<16x1xi1>
      %25 = vector.broadcast %24 : vector<16x1xi1> to vector<16x128xi1>
      %26 = vector.broadcast %cst_10 : f32 to vector<16x128xf32>
      %27 = arith.select %25, %11, %26 : vector<16x128xi1>, vector<16x128xf32>
      %cst_11 = arith.constant dense<0xFF800000> : vector<128xf32>
      %28 = vector.multi_reduction <maximumf>, %27, %cst_11 [0] : vector<16x128xf32> to vector<128xf32>
      %29 = vector.shape_cast %28 : vector<128xf32> to vector<1x128xf32>
      %c0_12 = arith.constant 0 : index
      %c0_13 = arith.constant 0 : index
      %30 = vector.load %arg10[%c0_12, %c0_13] : memref<1x128xf32, #tpu.memory_space<vmem>>, vector<1x128xf32>
      %31 = arith.maximumf %30, %29 : vector<1x128xf32>
      %32 = vector.broadcast %31 : vector<1x128xf32> to vector<16x128xf32>
      %33 = arith.subf %11, %32 : vector<16x128xf32>
      %34 = math.exp %33 : vector<16x128xf32>
      %cst_14 = arith.constant 0.000000e+00 : f32
      %35 = vector.shape_cast %5 : vector<16x1xi1> to vector<16x1xi1>
      %36 = vector.broadcast %35 : vector<16x1xi1> to vector<16x128xi1>
      %37 = vector.broadcast %cst_14 : f32 to vector<16x128xf32>
      %38 = arith.select %36, %34, %37 : vector<16x128xi1>, vector<16x128xf32>
      %cst_15 = arith.constant dense<0.000000e+00> : vector<128xf32>
      %39 = vector.multi_reduction <add>, %38, %cst_15 [0] : vector<16x128xf32> to vector<128xf32>
      %40 = vector.shape_cast %39 : vector<128xf32> to vector<1x128xf32>
      %c0_16 = arith.constant 0 : index
      %c0_17 = arith.constant 0 : index
      %41 = vector.load %arg11[%c0_16, %c0_17] : memref<1x128xf32, #tpu.memory_space<vmem>>, vector<1x128xf32>
      %c0_18 = arith.constant 0 : index
      %c0_19 = arith.constant 0 : index
      %42 = vector.load %arg10[%c0_18, %c0_19] : memref<1x128xf32, #tpu.memory_space<vmem>>, vector<1x128xf32>
      %43 = arith.subf %42, %31 : vector<1x128xf32>
      %44 = math.exp %43 : vector<1x128xf32>
      %45 = arith.mulf %41, %44 : vector<1x128xf32>
      %46 = arith.addf %45, %40 : vector<1x128xf32>
      %c0_20 = arith.constant 0 : index
      %c0_21 = arith.constant 0 : index
      %47 = vector.load %arg11[%c0_20, %c0_21] : memref<1x128xf32, #tpu.memory_space<vmem>>, vector<1x128xf32>
      tpu.vector_store %arg11[%c0_20, %c0_21], %46 {strides = array<i32>} : memref<1x128xf32, #tpu.memory_space<vmem>>, vector<1x128xf32>,
      %c0_22 = arith.constant 0 : index
      %c0_23 = arith.constant 0 : index
      %48 = vector.load %arg10[%c0_22, %c0_23] : memref<1x128xf32, #tpu.memory_space<vmem>>, vector<1x128xf32>
      tpu.vector_store %arg10[%c0_22, %c0_23], %31 {strides = array<i32>} : memref<1x128xf32, #tpu.memory_space<vmem>>, vector<1x128xf32>,
    } else {
    }
    %c1_i32 = arith.constant 1 : i32
    %15 = arith.cmpi eq, %arg0, %c1_i32 : i32
    %16 = arith.extui %15 : i1 to i32
    %c0_i32_6 = arith.constant 0 : i32
    %17 = arith.cmpi ne, %16, %c0_i32_6 : i32
    scf.if %17 {
      %c0_i32_8 = arith.constant 0 : i32
      %21 = arith.cmpi eq, %arg1, %c0_i32_8 : i32
      %22 = arith.extui %21 : i1 to i32
      %c0_i32_9 = arith.constant 0 : i32
      %23 = arith.cmpi ne, %22, %c0_i32_9 : i32
      scf.if %23 {
        %c0_31 = arith.constant 0 : index
        %c0_32 = arith.constant 0 : index
        %59 = vector.load %arg10[%c0_31, %c0_32] : memref<1x128xf32, #tpu.memory_space<vmem>>, vector<1x128xf32>
        %c0_33 = arith.constant 0 : index
        %c0_34 = arith.constant 0 : index
        %60 = vector.load %arg11[%c0_33, %c0_34] : memref<1x128xf32, #tpu.memory_space<vmem>>, vector<1x128xf32>
        %61 = math.log %60 : vector<1x128xf32>
        %62 = arith.addf %59, %61 : vector<1x128xf32>
        %c0_35 = arith.constant 0 : index
        %c0_36 = arith.constant 0 : index
        %63 = vector.load %arg10[%c0_35, %c0_36] : memref<1x128xf32, #tpu.memory_space<vmem>>, vector<1x128xf32>
        tpu.vector_store %arg10[%c0_35, %c0_36], %62 {strides = array<i32>} : memref<1x128xf32, #tpu.memory_space<vmem>>, vector<1x128xf32>,
        %cst_37 = arith.constant -1.000000e+30 : f32
        %64 = vector.broadcast %cst_37 : f32 to vector<1x128xf32>
        %c0_38 = arith.constant 0 : index
        %c0_39 = arith.constant 0 : index
        %65 = vector.load %arg12[%c0_38, %c0_39] : memref<1x128xf32, #tpu.memory_space<vmem>>, vector<1x128xf32>
        tpu.vector_store %arg12[%c0_38, %c0_39], %64 {strides = array<i32>} : memref<1x128xf32, #tpu.memory_space<vmem>>, vector<1x128xf32>,
        %cst_40 = arith.constant 0.000000e+00 : f32
        %66 = vector.broadcast %cst_40 : f32 to vector<1x128xf32>
        %c0_41 = arith.constant 0 : index
        %c0_42 = arith.constant 0 : index
        %67 = vector.load %arg13[%c0_41, %c0_42] : memref<1x128xf32, #tpu.memory_space<vmem>>, vector<1x128xf32>
        tpu.vector_store %arg13[%c0_41, %c0_42], %66 {strides = array<i32>} : memref<1x128xf32, #tpu.memory_space<vmem>>, vector<1x128xf32>,
      } else {
      }
      %c0_10 = arith.constant 0 : index
      %c0_11 = arith.constant 0 : index
      %24 = vector.load %arg10[%c0_10, %c0_11] : memref<1x128xf32, #tpu.memory_space<vmem>>, vector<1x128xf32>
      %25 = vector.broadcast %24 : vector<1x128xf32> to vector<16x128xf32>
      %26 = arith.subf %11, %25 : vector<16x128xf32>
      %27 = math.exp %26 : vector<16x128xf32>
      %28 = arith.truncf %27 : vector<16x128xf32> to vector<16x128xbf16>
      %c0_12 = arith.constant 0 : index
      %c0_13 = arith.constant 0 : index
      %29 = vector.load %arg5[%c0_12, %c0_13] : memref<128x128xbf16, #tpu.memory_space<vmem>>, vector<128x128xbf16>
      %cst_14 = arith.constant dense<0.000000e+00> : vector<16x128xf32>
      %30 = tpu.matmul %28, %29, %cst_14 {dimension_numbers = #tpu.dot_dimension_numbers<[1], [0], [0], [1], [0, 0, 1, 1], [], []>} : vector<16x128xbf16>, vector<128x128xbf16>, vector<16x128xf32> -> vector<16x128xf32>
      %c0_15 = arith.constant 0 : index
      %c0_16 = arith.constant 0 : index
      %31 = vector.load %arg6[%c0_15, %c0_16] : memref<1x128xf32, #tpu.memory_space<vmem>>, vector<1x128xf32>
      %32 = vector.broadcast %31 : vector<1x128xf32> to vector<16x128xf32>
      %33 = arith.addf %30, %32 : vector<16x128xf32>
      %cst_17 = arith.constant -1.000000e+30 : f32
      %34 = vector.shape_cast %5 : vector<16x1xi1> to vector<16x1xi1>
      %35 = vector.broadcast %34 : vector<16x1xi1> to vector<16x128xi1>
      %36 = vector.broadcast %cst_17 : f32 to vector<16x128xf32>
      %37 = arith.select %35, %33, %36 : vector<16x128xi1>, vector<16x128xf32>
      %cst_18 = arith.constant dense<0xFF800000> : vector<128xf32>
      %38 = vector.multi_reduction <maximumf>, %37, %cst_18 [0] : vector<16x128xf32> to vector<128xf32>
      %39 = vector.shape_cast %38 : vector<128xf32> to vector<1x128xf32>
      %c0_19 = arith.constant 0 : index
      %c0_20 = arith.constant 0 : index
      %40 = vector.load %arg12[%c0_19, %c0_20] : memref<1x128xf32, #tpu.memory_space<vmem>>, vector<1x128xf32>
      %41 = arith.maximumf %40, %39 : vector<1x128xf32>
      %42 = vector.broadcast %41 : vector<1x128xf32> to vector<16x128xf32>
      %43 = arith.subf %33, %42 : vector<16x128xf32>
      %44 = math.exp %43 : vector<16x128xf32>
      %cst_21 = arith.constant 0.000000e+00 : f32
      %45 = vector.shape_cast %5 : vector<16x1xi1> to vector<16x1xi1>
      %46 = vector.broadcast %45 : vector<16x1xi1> to vector<16x128xi1>
      %47 = vector.broadcast %cst_21 : f32 to vector<16x128xf32>
      %48 = arith.select %46, %44, %47 : vector<16x128xi1>, vector<16x128xf32>
      %cst_22 = arith.constant dense<0.000000e+00> : vector<128xf32>
      %49 = vector.multi_reduction <add>, %48, %cst_22 [0] : vector<16x128xf32> to vector<128xf32>
      %50 = vector.shape_cast %49 : vector<128xf32> to vector<1x128xf32>
      %c0_23 = arith.constant 0 : index
      %c0_24 = arith.constant 0 : index
      %51 = vector.load %arg13[%c0_23, %c0_24] : memref<1x128xf32, #tpu.memory_space<vmem>>, vector<1x128xf32>
      %c0_25 = arith.constant 0 : index
      %c0_26 = arith.constant 0 : index
      %52 = vector.load %arg12[%c0_25, %c0_26] : memref<1x128xf32, #tpu.memory_space<vmem>>, vector<1x128xf32>
      %53 = arith.subf %52, %41 : vector<1x128xf32>
      %54 = math.exp %53 : vector<1x128xf32>
      %55 = arith.mulf %51, %54 : vector<1x128xf32>
      %56 = arith.addf %55, %50 : vector<1x128xf32>
      %c0_27 = arith.constant 0 : index
      %c0_28 = arith.constant 0 : index
      %57 = vector.load %arg13[%c0_27, %c0_28] : memref<1x128xf32, #tpu.memory_space<vmem>>, vector<1x128xf32>
      tpu.vector_store %arg13[%c0_27, %c0_28], %56 {strides = array<i32>} : memref<1x128xf32, #tpu.memory_space<vmem>>, vector<1x128xf32>,
      %c0_29 = arith.constant 0 : index
      %c0_30 = arith.constant 0 : index
      %58 = vector.load %arg12[%c0_29, %c0_30] : memref<1x128xf32, #tpu.memory_space<vmem>>, vector<1x128xf32>
      tpu.vector_store %arg12[%c0_29, %c0_30], %41 {strides = array<i32>} : memref<1x128xf32, #tpu.memory_space<vmem>>, vector<1x128xf32>,
    } else {
    }
    %c2_i32 = arith.constant 2 : i32
    %18 = arith.cmpi eq, %arg0, %c2_i32 : i32
    %19 = arith.extui %18 : i1 to i32
    %c0_i32_7 = arith.constant 0 : i32
    %20 = arith.cmpi ne, %19, %c0_i32_7 : i32
    scf.if %20 {
      %c0_i32_8 = arith.constant 0 : i32
      %21 = arith.cmpi eq, %arg1, %c0_i32_8 : i32
      %22 = arith.extui %21 : i1 to i32
      %c0_i32_9 = arith.constant 0 : i32
      %23 = arith.cmpi ne, %22, %c0_i32_9 : i32
      scf.if %23 {
        %c0_26 = arith.constant 0 : index
        %c0_27 = arith.constant 0 : index
        %45 = vector.load %arg12[%c0_26, %c0_27] : memref<1x128xf32, #tpu.memory_space<vmem>>, vector<1x128xf32>
        %c0_28 = arith.constant 0 : index
        %c0_29 = arith.constant 0 : index
        %46 = vector.load %arg13[%c0_28, %c0_29] : memref<1x128xf32, #tpu.memory_space<vmem>>, vector<1x128xf32>
        %47 = math.log %46 : vector<1x128xf32>
        %48 = arith.addf %45, %47 : vector<1x128xf32>
        %c0_30 = arith.constant 0 : index
        %c0_31 = arith.constant 0 : index
        %49 = vector.load %arg12[%c0_30, %c0_31] : memref<1x128xf32, #tpu.memory_space<vmem>>, vector<1x128xf32>
        tpu.vector_store %arg12[%c0_30, %c0_31], %48 {strides = array<i32>} : memref<1x128xf32, #tpu.memory_space<vmem>>, vector<1x128xf32>,
      } else {
      }
      %c0_10 = arith.constant 0 : index
      %c0_11 = arith.constant 0 : index
      %24 = vector.load %arg10[%c0_10, %c0_11] : memref<1x128xf32, #tpu.memory_space<vmem>>, vector<1x128xf32>
      %25 = vector.broadcast %24 : vector<1x128xf32> to vector<16x128xf32>
      %26 = arith.subf %11, %25 : vector<16x128xf32>
      %27 = math.exp %26 : vector<16x128xf32>
      %28 = arith.truncf %27 : vector<16x128xf32> to vector<16x128xbf16>
      %c0_12 = arith.constant 0 : index
      %c0_13 = arith.constant 0 : index
      %29 = vector.load %arg5[%c0_12, %c0_13] : memref<128x128xbf16, #tpu.memory_space<vmem>>, vector<128x128xbf16>
      %cst_14 = arith.constant dense<0.000000e+00> : vector<16x128xf32>
      %30 = tpu.matmul %28, %29, %cst_14 {dimension_numbers = #tpu.dot_dimension_numbers<[1], [0], [0], [1], [0, 0, 1, 1], [], []>} : vector<16x128xbf16>, vector<128x128xbf16>, vector<16x128xf32> -> vector<16x128xf32>
      %c0_15 = arith.constant 0 : index
      %c0_16 = arith.constant 0 : index
      %31 = vector.load %arg6[%c0_15, %c0_16] : memref<1x128xf32, #tpu.memory_space<vmem>>, vector<1x128xf32>
      %32 = vector.broadcast %31 : vector<1x128xf32> to vector<16x128xf32>
      %33 = arith.addf %30, %32 : vector<16x128xf32>
      %c0_17 = arith.constant 0 : index
      %c0_18 = arith.constant 0 : index
      %34 = vector.load %arg12[%c0_17, %c0_18] : memref<1x128xf32, #tpu.memory_space<vmem>>, vector<1x128xf32>
      %35 = vector.broadcast %34 : vector<1x128xf32> to vector<16x128xf32>
      %36 = arith.subf %33, %35 : vector<16x128xf32>
      %37 = math.exp %36 : vector<16x128xf32>
      %38 = arith.truncf %37 : vector<16x128xf32> to vector<16x128xbf16>
      %c0_19 = arith.constant 0 : index
      %c0_20 = arith.constant 0 : index
      %39 = vector.load %arg7[%c0_19, %c0_20] : memref<128x128xbf16, #tpu.memory_space<vmem>>, vector<128x128xbf16>
      %cst_21 = arith.constant dense<0.000000e+00> : vector<16x128xf32>
      %40 = tpu.matmul %38, %39, %cst_21 {dimension_numbers = #tpu.dot_dimension_numbers<[1], [0], [0], [1], [0, 0, 1, 1], [], []>} : vector<16x128xbf16>, vector<128x128xbf16>, vector<16x128xf32> -> vector<16x128xf32>
      %c0_22 = arith.constant 0 : index
      %c0_23 = arith.constant 0 : index
      %41 = vector.load %arg8[%c0_22, %c0_23] : memref<1x128xf32, #tpu.memory_space<vmem>>, vector<1x128xf32>
      %42 = vector.broadcast %41 : vector<1x128xf32> to vector<16x128xf32>
      %43 = arith.addf %40, %42 : vector<16x128xf32>
      %c0_24 = arith.constant 0 : index
      %c0_25 = arith.constant 0 : index
      %44 = vector.load %arg9[%c0_24, %c0_25] : memref<16x128xf32, #tpu.memory_space<vmem>>, vector<16x128xf32>
      tpu.vector_store %arg9[%c0_24, %c0_25], %43 {strides = array<i32>} : memref<16x128xf32, #tpu.memory_space<vmem>>, vector<16x128xf32>,
    } else {
    }
    return
  }
  func.func @transform_0(%arg0: i32, %arg1: i32) -> (i32, i32) {
    %c0_i32 = arith.constant 0 : i32
    %c0_i32_0 = arith.constant 0 : i32
    return %arg1, %c0_i32 : i32, i32
  }
  func.func @transform_1(%arg0: i32, %arg1: i32) -> (i32, i32) {
    %c0_i32 = arith.constant 0 : i32
    %c0_i32_0 = arith.constant 0 : i32
    %c0_i32_1 = arith.constant 0 : i32
    return %c0_i32, %c0_i32_0 : i32, i32
  }
  func.func @transform_2(%arg0: i32, %arg1: i32) -> (i32, i32) {
    %c0_i32 = arith.constant 0 : i32
    %c0_i32_0 = arith.constant 0 : i32
    %c0_i32_1 = arith.constant 0 : i32
    return %c0_i32, %c0_i32_0 : i32, i32
  }
  func.func @transform_3(%arg0: i32, %arg1: i32) -> (i32, i32) {
    %c0_i32 = arith.constant 0 : i32
    %c0_i32_0 = arith.constant 0 : i32
    %c0_i32_1 = arith.constant 0 : i32
    return %c0_i32, %c0_i32_0 : i32, i32
  }
  func.func @transform_4(%arg0: i32, %arg1: i32) -> (i32, i32) {
    %c0_i32 = arith.constant 0 : i32
    %c0_i32_0 = arith.constant 0 : i32
    %c0_i32_1 = arith.constant 0 : i32
    return %c0_i32, %c0_i32_0 : i32, i32
  }
  func.func @transform_5(%arg0: i32, %arg1: i32) -> (i32, i32) {
    %c0_i32 = arith.constant 0 : i32
    %c0_i32_0 = arith.constant 0 : i32
    %c0_i32_1 = arith.constant 0 : i32
    return %c0_i32, %c0_i32_0 : i32, i32
  }
  func.func @transform_6(%arg0: i32, %arg1: i32) -> (i32, i32) {
    %c0_i32 = arith.constant 0 : i32
    %c0_i32_0 = arith.constant 0 : i32
    %c0_i32_1 = arith.constant 0 : i32
    return %c0_i32, %c0_i32_0 : i32, i32
  }
  func.func @transform_7(%arg0: i32, %arg1: i32) -> (i32, i32) {
    %c0_i32 = arith.constant 0 : i32
    %c0_i32_0 = arith.constant 0 : i32
    return %arg1, %c0_i32 : i32, i32
  }
}

</mosaic_0001>

<bundles_post_ra>
// kernel: tpu_custom_call.1
= control target key start
LH: loop header
LB: loop body
LE: loop exit
PB: predicated region body
PF: predicated region fallthrough
CT: control target
= control target key end

     0   :  { %12 = vsyncpa [#allocation7], 0  ;;  %s1510_s0 = inlined_call_operand.hbm [shape: bf16[16,32], index: 0, kind: input, shape index: {}]   ;;  %s1511_s1 = inlined_call_operand.hbm [shape: bf16[32,128], index: 1, kind: input, shape index: {}]   ;;  %s1512_s2 = inlined_call_operand.vmem [shape: f32[1,128], index: 2, kind: input, shape index: {}]   ;;  %s1513_s3 = inlined_call_operand.hbm [shape: bf16[128,128], index: 3, kind: input, shape index: {}]   ;;  %s1514_s4 = inlined_call_operand.vmem [shape: f32[1,128], index: 4, kind: input, shape index: {}]   ;;  %s1515_s5 = inlined_call_operand.hbm [shape: bf16[128,128], index: 5, kind: input, shape index: {}]   ;;  %s1516_s6 = inlined_call_operand.vmem [shape: f32[1,128], index: 6, kind: input, shape index: {}]   ;;  %s1517_s7 = inlined_call_operand.hbm [shape: f32[16,128], index: 7, kind: output, shape index: {}]  }
   0x1   :  { %13 = vsyncpa [#allocation10], 0 }
   0x2   :  { %14 = vsyncpa [#allocation13], 0 }
   0x3   :  { %15 = vsyncpa [#allocation8], 0  ;;  %s1398_s24 = smov 0   ;;  %s1400_s25 = smov 0  }
   0x4   :  { %s1402_s26 = smov 0  }
   0x5 LB: > { %s892_s27 = sadd.s32 4294967295, %s1343_s26   ;;  %p893_p0 = scmp.ge.s32.totalorder %s1343_s26, 1  ;;  %s1343_s26 = sphi %s1402_s26, %s21_s26   ;;  %s1339_s25 = sphi %s1400_s25, %s1522_s25   ;;  %s1335_s24 = sphi %s1398_s24, %s1521_s24  }
   0x6   : > { %p216_p1 = scmp.lt.s32.totalorder %s1343_s26, 4  ;;  %p1418_p2 = scmp.eq.s32.totalorder %s892_s27, 0 }
   0x7   : > { %s244_s8 = sshll.u32 %s1511_s1, 4  ;;  %s1345_s10 = smov [#allocation9]   ;;  %s245_s8 = int_to_ptr.hbm [resolvable:$true] %s244_s8 }
   0x8   : > { %p1425_p3 = pnand %p893_p0, %p216_p1  ;;  %s246_s11 = sshll.u32 %s1345_s10, 4  ;;  %s247_s11 = int_to_ptr.vmem [resolvable:$true] %s246_s11 }
   0x9   : > { %s33_s13 = sadd.s32 1, %s1339_s25  ;;  %s1346_s14 = smov 64  }
   0xa   : > { %p1066_p4 = pneg %p1425_p3  ;;  %p35_p6 = scmp.ge.s32.totalorder %s33_s13, 3 }
   0xb   : > { %s1347_s15 = smov 4   ;;  %s230_s18 = sshll.u32 %s1510_s0, 4  ;;  %s231_s18 = int_to_ptr.hbm [resolvable:$true] %s230_s18 }
   0xc   : > { %p1433_p5 = pnand %p1418_p2, %p1066_p4  ;;  %s1524_s13 = smov (%p35_p6, %s33_s13), 0 }
   0xd   : > { %s1348_s19 = smov [#allocation6]   ;;  %s261_s23 = sshll.u32 %s1513_s3, 4  ;;  %s262_s23 = int_to_ptr.hbm [resolvable:$true] %s261_s23 }
   0xe   : > { %1072 = dma.hbm_to_vmem [thread:$0]  (!%p1433_p5), %s245_s8, 256, %s247_s11, [#allocation10], %s1346_s14, %s1346_s14, %s1347_s15  }
   0xf   : > { %s232_s20 = sshll.u32 %s1348_s19, 4  ;;  %s1349_s29 = smov [#allocation11]   ;;  %s233_s20 = int_to_ptr.vmem [resolvable:$true] %s232_s20 }
  0x10   : > { %1069 = dma.hbm_to_vmem [thread:$0]  (!%p1433_p5), %s231_s18, 128, %s233_s20, [#allocation7], %s1346_s14, %s1346_s14, %s1347_s15  }
  0x11   : > { %s263_s30 = sshll.u32 %s1349_s29, 4  ;;  %s278_s11 = sshll.u32 %s1515_s5, 4  ;;  %s264_s30 = int_to_ptr.vmem [resolvable:$true] %s263_s30  ;;  %s279_s11 = int_to_ptr.hbm [resolvable:$true] %s278_s11 }
  0x12   : > { %1075 = dma.hbm_to_vmem [thread:$0]  (!%p1433_p5), %s262_s23, 1024, %s264_s30, [#allocation10], %s1346_s14, %s1346_s14, %s1347_s15  }
  0x13   : > { %s1350_s16 = smov [#allocation12]   ;;  %299 = sbr.rel (%p1425_p3) target bundleno = 760 (0x2f8), region = 48 }
  0x14   : > { %s280_s17 = sshll.u32 %s1350_s16, 4  ;;  %s281_s17 = int_to_ptr.vmem [resolvable:$true] %s280_s17 }
  0x15   : > { %1078 = dma.hbm_to_vmem [thread:$0]  (!%p1433_p5), %s279_s11, 1024, %s281_s17, [#allocation13], %s1346_s14, %s1346_s14, %s1347_s15  }
  0x18   : > { %1318 = dma.done.wait (%p1418_p2), [#allocation7], 128  }
  0x19   : > { %1320 = vsyncadd (%p1418_p2), [#allocation7], 4294967168 }
  0x1a   : > { %1322 = dma.done.wait (%p1418_p2), [#allocation10], 1280  }
  0x1b   : > { %1324 = vsyncadd (%p1418_p2), [#allocation10], 4294966016 }
  0x1c   : > { %1326 = dma.done.wait (%p1418_p2), [#allocation13], 1024  }
  0x1d   : > { %1328 = vsyncadd (%p1418_p2), [#allocation13], 4294966272  ;;  %v1021_v0 = vld [vmem:[#allocation9 + $0x8] sm:$0xff]  ;;  %v1020_v1 = vld [vmem:[#allocation9] sm:$0xff]  ;;  %vm376_vm0 = vcmask 261120   ;;  %p916_p7 = scmp.ne.s32.totalorder %s1335_s24, 0 }
  0x1e   : > { %386 = vmatpush.bf16.msra.mxu0 %v1021_v0  ;;  %v1019_v2 = vld [vmem:[#allocation6] sm:$0xff]  ;;  %v1126_v3 = vld [vmem:[%s1512_s2] ss:$0 sm:$0xff] }
  0x22   : > { %387 = vmatpush.bf16.msra.mxu0 %v1020_v1 }
  0x25   : > { %915 = vmatmul.msk.bf16.vlgmr.msra.gmra.mxu0 %vm376_vm0, %v1019_v2 }
  0xa2   : > { %v389_v4 = vpop.f32.mrf.mxu0 }
  0xa3   : > { %v1474_v5 = vadd.f32 %v1126_v3, %v389_v4 }
  0xa7   : > { %397 = sbr.rel (%p916_p7) target bundleno = 216 (0xd8), region = 68 }
  0xaa   : > { %v391_v6 = vpop.f32.mrf.mxu0 }
  0xab   : > { %v1476_v7 = vadd.f32 %v1126_v3, %v391_v6 }
  0xac   : > { %v410_v8 = vmax.f32 %v1474_v5, -1e+30  ;;  %v1351_v9 = vmov -1e+30   ;;  %v1352_v11 = vmov 0.0  }
  0xad   : > { %402 = vst [vmem:[#allocation2] sm:$0x1] %v1351_v9 }
  0xae   : > { %v411_v10 = vrot.slane %v410_v8, 4  ;;  %403 = vst [vmem:[#allocation3] sm:$0x1] %v1352_v11 }
  0xb0   : > { %v412_v12 = vmax.f32 %v410_v8, %v411_v10 }
  0xb2   : > { %v413_v13 = vrot.slane %v412_v12, 2 }
  0xb4   : > { %v414_v14 = vmax.f32 %v412_v12, %v413_v13  ;;  %v417_v16 = vld [vmem:[#allocation2] sm:$0x1] }
  0xb5   : > { %v437_v30 = vld [vmem:[#allocation3] sm:$0x1] }
  0xb6   : > { %v415_v15 = vrot.slane %v414_v14, 1 }
  0xb8   : > { %v416_v17 = vmax.f32 %v414_v14, %v415_v15 }
  0xba   : > { %v418_v18 = vmax.f32 %v417_v16, %v416_v17 }
  0xbc   : > { %v420_v19 = vperm.slane %v418_v18, 0  ;;  %444 = vst [vmem:[#allocation2] sm:$0x1] %v418_v18  ;;  %v438_v22 = vsub.f32 %v417_v16, %v418_v18 }
  0xbe   : > { %v422_v20 = vsub.f32 %v1474_v5, %v420_v19  ;;  %v439_v23 = vmul.f32 1.442695, %v438_v22 }
  0xc0   : > { %v424_v21 = vmul.f32 1.442695, %v422_v20 }
  0xc2   : > { %1127 = vpow2.f32 %v424_v21 }
  0xc3   : > { %1129 = vpow2.f32 %v439_v23 }
  0xc8   : > { %v1128_v24 = vpop.eup %1127 }
  0xc9   : > { %v431_v25 = vrot.slane %v1128_v24, 4  ;;  %v1130_v29 = vpop.eup %1129 }
  0xca   : > { %v441_v33 = vmul.f32 %v1130_v29, %v437_v30 }
  0xcb   : > { %v432_v26 = vadd.f32 %v1128_v24, %v431_v25 }
  0xcd   : > { %v433_v27 = vrot.slane %v432_v26, 2 }
  0xcf   : > { %v434_v28 = vadd.f32 %v433_v27, %v432_v26 }
  0xd1   : > { %v435_v31 = vrot.slane %v434_v28, 1 }
  0xd3   : > { %v436_v32 = vadd.f32 %v435_v31, %v434_v28 }
  0xd5   : > { %v442_v34 = vadd.f32 %v441_v33, %v436_v32 }
  0xd7   : > { %443 = vst [vmem:[#allocation3] sm:$0x1] %v442_v34 }
  0xd8 PF: > { %p917_p8 = scmp.ne.s32.totalorder %s1335_s24, 1 }
  0xda   : > { %448 = sbr.rel (%p917_p8) target bundleno = 429 (0x1ad), region = 76 }
  0xdf   : > { %v1029_v35 = vld [vmem:[#allocation11 + $0x38] sm:$0xff]  ;;  %v1028_v36 = vld [vmem:[#allocation11 + $0x30] sm:$0xff]  ;;  %v454_v37 = vld [vmem:[#allocation3] sm:$0x1]  ;;  %v1353_v39 = vmov -1e+30  }
  0xe0   : > { %540 = vmatpush.bf16.msra.mxu0 %v1029_v35  ;;  %1133 = vlog2.f32 %v454_v37  ;;  %v1027_v38 = vld [vmem:[#allocation11 + $0x28] sm:$0xff]  ;;  %459 = vst [vmem:[#allocation4] sm:$0x1] %v1353_v39  ;;  %v1354_v40 = vmov 0.0   ;;  %v1026_v42 = vld [vmem:[#allocation11 + $0x20] sm:$0xff]  ;;  %v1025_v46 = vld [vmem:[#allocation11 + $0x18] sm:$0xff] }
  0xe1   : > { %460 = vst [vmem:[#allocation5] sm:$0x1] %v1354_v40  ;;  %v453_v43 = vld [vmem:[#allocation2] sm:$0x1]  ;;  %v1024_v47 = vld [vmem:[#allocation11 + $0x10] sm:$0xff]  ;;  %v1023_v48 = vld [vmem:[#allocation11 + $0x8] sm:$0xff] }
  0xe2   : > { %v1022_v52 = vld [vmem:[#allocation11] sm:$0xff] }
  0xe3   : > { %v1132_v58 = vld [vmem:[%s1514_s4] ss:$0 sm:$0xff] }
  0xe4   : > { %541 = vmatpush.bf16.msra.mxu0 %v1028_v36 }
  0xe6   : > { %v1134_v41 = vpop.eup %1133 }
  0xe7   : > { %v456_v44 = vmul.f32 0.6931472, %v1134_v41  ;;  %v567_v4 = vld [vmem:[#allocation4] sm:$0x1] }
  0xe8   : > { %542 = vmatpush.bf16.msra.mxu0 %v1027_v38  ;;  %v587_v20 = vld [vmem:[#allocation5] sm:$0x1] }
  0xe9   : > { %v457_v45 = vadd.f32 %v456_v44, %v453_v43 }
  0xeb   : > { %458 = vst [vmem:[#allocation2] sm:$0x1] %v457_v45 }
  0xec   : > { %543 = vmatpush.bf16.msra.mxu0 %v1026_v42 }
  0xf0   : > { %544 = vmatpush.bf16.msra.mxu0 %v1025_v46 }
  0xf2   : > { %v1131_v49 = vld [vmem:[#allocation2] ss:$0 sm:$0xff] }
  0xf3   : > { %v465_v50 = vsub.f32 %v1474_v5, %v1131_v49  ;;  %v466_v51 = vsub.f32 %v1476_v7, %v1131_v49 }
  0xf4   : > { %545 = vmatpush.bf16.msra.mxu0 %v1024_v47 }
  0xf5   : > { %v467_v53 = vmul.f32 1.442695, %v465_v50  ;;  %v469_v54 = vmul.f32 1.442695, %v466_v51 }
  0xf7   : > { %1135 = vpow2.f32 %v467_v53 }
  0xf8   : > { %546 = vmatpush.bf16.msra.mxu0 %v1023_v48  ;;  %1137 = vpow2.f32 %v469_v54 }
  0xfc   : > { %547 = vmatpush.bf16.msra.mxu0 %v1022_v52 }
  0xfd   : > { %v1136_v55 = vpop.eup %1135 }
  0xfe   : > { %v1138_v56 = vpop.eup %1137 }
  0xff   : > { %v471_v57 = vpack.c.bf16 %v1138_v56, %v1136_v55 }
 0x101   : > { %548 = vmatmul.bf16.vlgmr.msra.gmra.mxu0 %v471_v57 }
 0x17e   : > { %v549_v59 = vpop.f32.mrf.mxu0 }
 0x17f   : > { %v550_v60 = vadd.f32 %v1132_v58, %v549_v59 }
 0x181   : > { %v560_v61 = vmax.f32 %v550_v60, -1e+30 }
 0x183   : > { %v561_v62 = vrot.slane %v560_v61, 4 }
 0x185   : > { %v562_v63 = vmax.f32 %v560_v61, %v561_v62 }
 0x186   : > { %v551_v0 = vpop.f32.mrf.mxu0 }
 0x187   : > { %v563_v1 = vrot.slane %v562_v63, 2 }
 0x189   : > { %v564_v2 = vmax.f32 %v562_v63, %v563_v1 }
 0x18b   : > { %v565_v3 = vrot.slane %v564_v2, 1 }
 0x18d   : > { %v566_v6 = vmax.f32 %v564_v2, %v565_v3 }
 0x18f   : > { %v568_v8 = vmax.f32 %v567_v4, %v566_v6 }
 0x191   : > { %v570_v9 = vperm.slane %v568_v8, 0  ;;  %594 = vst [vmem:[#allocation4] sm:$0x1] %v568_v8  ;;  %v588_v12 = vsub.f32 %v567_v4, %v568_v8 }
 0x193   : > { %v572_v10 = vsub.f32 %v550_v60, %v570_v9  ;;  %v589_v13 = vmul.f32 1.442695, %v588_v12 }
 0x195   : > { %v574_v11 = vmul.f32 1.442695, %v572_v10 }
 0x197   : > { %1139 = vpow2.f32 %v574_v11 }
 0x198   : > { %1141 = vpow2.f32 %v589_v13 }
 0x19d   : > { %v1140_v14 = vpop.eup %1139 }
 0x19e   : > { %v581_v15 = vrot.slane %v1140_v14, 4  ;;  %v1142_v19 = vpop.eup %1141 }
 0x19f   : > { %v591_v23 = vmul.f32 %v1142_v19, %v587_v20 }
 0x1a0   : > { %v582_v16 = vadd.f32 %v1140_v14, %v581_v15 }
 0x1a2   : > { %v583_v17 = vrot.slane %v582_v16, 2 }
 0x1a4   : > { %v584_v18 = vadd.f32 %v583_v17, %v582_v16 }
 0x1a6   : > { %v585_v21 = vrot.slane %v584_v18, 1 }
 0x1a8   : > { %v586_v22 = vadd.f32 %v585_v21, %v584_v18 }
 0x1aa   : > { %v592_v24 = vadd.f32 %v591_v23, %v586_v22 }
 0x1ac   : > { %593 = vst [vmem:[#allocation5] sm:$0x1] %v592_v24 }
 0x1ad PF: > { %p950_p9 = scmp.ne.s32.totalorder %s1335_s24, 2 }
 0x1af   : > { %598 = sbr.rel (%p950_p9) target bundleno = 754 (0x2f2), region = 84 }
 0x1b4   : > { %v1037_v25 = vld [vmem:[#allocation11 + $0x38] sm:$0xff]  ;;  %v1036_v26 = vld [vmem:[#allocation11 + $0x30] sm:$0xff]  ;;  %v604_v28 = vld [vmem:[#allocation5] sm:$0x1] }
 0x1b5   : > { %688 = vmatpush.bf16.msra.mxu0 %v1037_v25  ;;  %v1045_v27 = vld [vmem:[#allocation12 + $0x38] sm:$0xff]  ;;  %v1044_v29 = vld [vmem:[#allocation12 + $0x30] sm:$0xff]  ;;  %1147 = vlog2.f32 %v604_v28  ;;  %v1035_v30 = vld [vmem:[#allocation11 + $0x28] sm:$0xff] }
 0x1b6   : > { %781 = vmatpush.bf16.msra.mxu1 %v1045_v27  ;;  %v1143_v31 = vld [vmem:[#allocation2] ss:$0 sm:$0xff]  ;;  %v603_v35 = vld [vmem:[#allocation4] sm:$0x1]  ;;  %v1033_v38 = vld [vmem:[#allocation11 + $0x18] sm:$0xff] }
 0x1b7   : > { %v1034_v32 = vld [vmem:[#allocation11 + $0x20] sm:$0xff]  ;;  %v613_v34 = vsub.f32 %v1474_v5, %v1143_v31  ;;  %v614_v36 = vsub.f32 %v1476_v7, %v1143_v31  ;;  %v1032_v42 = vld [vmem:[#allocation11 + $0x10] sm:$0xff]  ;;  %v1031_v43 = vld [vmem:[#allocation11 + $0x8] sm:$0xff] }
 0x1b8   : > { %v1030_v5 = vld [vmem:[#allocation11] sm:$0xff]  ;;  %v1043_v7 = vld [vmem:[#allocation12 + $0x28] sm:$0xff]  ;;  %v1041_v48 = vld [vmem:[#allocation12 + $0x18] sm:$0xff] }
 0x1b9   : > { %689 = vmatpush.bf16.msra.mxu0 %v1036_v26  ;;  %v615_v40 = vmul.f32 1.442695, %v613_v34  ;;  %v617_v41 = vmul.f32 1.442695, %v614_v36  ;;  %v1042_v47 = vld [vmem:[#allocation12 + $0x20] sm:$0xff]  ;;  %v1040_v49 = vld [vmem:[#allocation12 + $0x10] sm:$0xff] }
 0x1ba   : > { %782 = vmatpush.bf16.msra.mxu1 %v1044_v29  ;;  %v1039_v50 = vld [vmem:[#allocation12 + $0x8] sm:$0xff]  ;;  %v1038_v51 = vld [vmem:[#allocation12] sm:$0xff] }
 0x1bb   : > { %v1148_v33 = vpop.eup %1147  ;;  %1149 = vpow2.f32 %v615_v40  ;;  %v1144_v52 = vld [vmem:[%s1514_s4] ss:$0 sm:$0xff] }
 0x1bc   : > { %v606_v37 = vmul.f32 0.6931472, %v1148_v33  ;;  %1151 = vpow2.f32 %v617_v41  ;;  %v1146_v1 = vld [vmem:[%s1516_s6] ss:$0 sm:$0xff] }
 0x1bd   : > { %690 = vmatpush.bf16.msra.mxu0 %v1035_v30 }
 0x1be   : > { %v607_v39 = vadd.f32 %v606_v37, %v603_v35  ;;  %783 = vmatpush.bf16.msra.mxu1 %v1043_v7 }
 0x1c0   : > { %608 = vst [vmem:[#allocation4] sm:$0x1] %v607_v39 }
 0x1c1   : > { %691 = vmatpush.bf16.msra.mxu0 %v1034_v32  ;;  %v1150_v44 = vpop.eup %1149 }
 0x1c2   : > { %v1152_v45 = vpop.eup %1151  ;;  %784 = vmatpush.bf16.msra.mxu1 %v1042_v47 }
 0x1c3   : > { %v619_v46 = vpack.c.bf16 %v1152_v45, %v1150_v44 }
 0x1c5   : > { %692 = vmatpush.bf16.msra.mxu0 %v1033_v38 }
 0x1c6   : > { %785 = vmatpush.bf16.msra.mxu1 %v1041_v48 }
 0x1c7   : > { %v1145_v55 = vld [vmem:[#allocation4] ss:$0 sm:$0xff] }
 0x1c9   : > { %693 = vmatpush.bf16.msra.mxu0 %v1032_v42 }
 0x1ca   : > { %786 = vmatpush.bf16.msra.mxu1 %v1040_v49 }
 0x1cd   : > { %694 = vmatpush.bf16.msra.mxu0 %v1031_v43 }
 0x1ce   : > { %787 = vmatpush.bf16.msra.mxu1 %v1039_v50 }
 0x1d1   : > { %695 = vmatpush.bf16.msra.mxu0 %v1030_v5 }
 0x1d2   : > { %788 = vmatpush.bf16.msra.mxu1 %v1038_v51 }
 0x1d4   : > { %696 = vmatmul.bf16.vlgmr.msra.gmra.mxu0 %v619_v46 }
 0x251   : > { %v697_v53 = vpop.f32.mrf.mxu0 }
 0x252   : > { %v698_v54 = vadd.f32 %v1144_v52, %v697_v53 }
 0x254   : > { %v706_v56 = vsub.f32 %v698_v54, %v1145_v55 }
 0x256   : > { %v708_v59 = vmul.f32 1.442695, %v706_v56 }
 0x258   : > { %1153 = vpow2.f32 %v708_v59 }
 0x259   : > { %v699_v57 = vpop.f32.mrf.mxu0 }
 0x25a   : > { %v700_v58 = vadd.f32 %v1144_v52, %v699_v57 }
 0x25c   : > { %v707_v60 = vsub.f32 %v700_v58, %v1145_v55 }
 0x25e   : > { %v710_v61 = vmul.f32 1.442695, %v707_v60  ;;  %v1154_v62 = vpop.eup %1153 }
 0x260   : > { %1155 = vpow2.f32 %v710_v61 }
 0x266   : > { %v1156_v63 = vpop.eup %1155 }
 0x267   : > { %v712_v0 = vpack.c.bf16 %v1156_v63, %v1154_v62 }
 0x269   : > { %789 = vmatmul.bf16.vlgmr.msra.gmra.mxu1 %v712_v0 }
 0x2e6   : > { %v790_v2 = vpop.f32.mrf.mxu1 }
 0x2e7   : > { %v791_v3 = vadd.f32 %v1146_v1, %v790_v2 }
 0x2e9   : > { %795 = vst [vmem:[#allocation14] sm:$0xff] %v791_v3 }
 0x2ee   : > { %v792_v4 = vpop.f32.mrf.mxu1 }
 0x2ef   : > { %v793_v6 = vadd.f32 %v1146_v1, %v792_v4 }
 0x2f1   : > { %796 = vst [vmem:[#allocation14 + $0x8] sm:$0xff] %v793_v6 }
 0x2f2 PF: > { %p1087_p10 = scmp.eq.s32.totalorder %s892_s27, 2  ;;  %s807_s22 = sshll.u32 %s1517_s7, 4  ;;  %s808_s22 = int_to_ptr.hbm [resolvable:$true] %s807_s22 }
 0x2f3   : > { %s1355_s23 = smov [#allocation14]   ;;  %s1356_s30 = smov 128  }
 0x2f4   : > { %s805_s29 = sshll.u32 %s1355_s23, 4  ;;  %s1357_s8 = smov 8   ;;  %s806_s29 = int_to_ptr.vmem [resolvable:$true] %s805_s29 }
 0x2f5   : > { %1063 = dma.vmem_to_hbm [thread:$0]  (%p1087_p10), %s806_s29, 256, %s808_s22, [#allocation8], %s1356_s30, %s1356_s30, %s1357_s8  }
 0x2f6   : > { %1330 = dma.done.wait (%p1087_p10), [#allocation8], 256  }
 0x2f7   : > { %1332 = vsyncadd (%p1087_p10), [#allocation8], 4294967040 }
 0x2f8 PF: > { %s21_s26 = sadd.s32 1, %s1343_s26   ;;  %s1521_s24 = smov %s1339_s25 }
 0x2f9   : > { %p18_p11 = scmp.ge.s32.totalorder %s21_s26, 5   ;;  %s1522_s25 = smov %s1524_s13 }
 0x2fb   :  { %20 = sbr.rel (!%p18_p11) target bundleno = 5 (0x5), region = 115 }
 0x300   :  { %824 = vsyncpa [#allocation7], 1 }
 0x301   :  { %826 = vsyncpa [#allocation7 + $0x1], 1 }
 0x302   :  { %827 = vsyncpa [#allocation10], 1 }
 0x303   :  { %828 = vsyncpa [#allocation13], 1 }
 0x304   :  { %829 = vsyncpa [#allocation8], 1 }
 0x305   :  { %831 = vsyncpa [#allocation8 + $0x1], 1 }

</bundles_post_ra>
